<compile_context>
chip_gen: v6e
topology: v6e:2x2x1
jax: 0.10.0
libtpu: 0.0.40
codegen_flags: <defaults>
</compile_context>

<pallas_src>
import jax
import jax.numpy as jnp
from jax import lax
from jax.experimental import pallas as pl
from jax.experimental.pallas import tpu as pltpu


_NUM_CORES = 2  # width of the "parallel" grid axis (both TCs on v7x; harmless on 1-TC chips)


def _round_up(x, m):
    return ((x + m - 1) // m) * m


def _contrastive_loss_kernel(margin, weight_diff, eps, true_b, block_b,
                             tiles_per_core, needs_mask):
    def kernel(o1_ref, o2_ref, t_ref, out_ref, acc_ref):
        c = pl.program_id(0)                      # parallel (core) axis
        i = pl.program_id(1)                      # sequential reduction axis
        blk = c * tiles_per_core + i              # logical (unclamped) block index

        @pl.when(i == 0)
        def _init():
            acc_ref[...] = jnp.zeros_like(acc_ref)

        o1 = o1_ref[...].astype(jnp.float32)      # (TB, D)
        o2 = o2_ref[...].astype(jnp.float32)      # (TB, D)
        t = t_ref[...].astype(jnp.float32)        # (TB, 1)

        # F.pairwise_distance adds eps to the difference before the norm.
        diff = o1 - o2 + eps
        sq = jnp.sum(diff * diff, axis=-1, keepdims=True)   # (TB, 1)
        d = jnp.sqrt(sq)

        loss_same = 0.5 * sq                                 # reuse squared distance
        hinge = jnp.maximum(margin - d, 0.0)
        loss_diff = 0.5 * hinge * hinge * weight_diff
        per_row = t * loss_same + (1.0 - t) * loss_diff      # (TB, 1)

        if needs_mask:
            # Only tiles that overrun the true batch (remainder tile, or the
            # clamped/duplicated tiles on the second core) pay for masking.
            tile_overruns = (blk + 1) * block_b > true_b

            @pl.when(tile_overruns)
            def _masked_add():
                row = blk * block_b + lax.broadcasted_iota(
                    jnp.int32, per_row.shape, 0)
                acc_ref[...] = acc_ref[...] + jnp.where(row < true_b, per_row, 0.0)

            @pl.when(jnp.logical_not(tile_overruns))
            def _full_add():
                acc_ref[...] = acc_ref[...] + per_row
        else:
            acc_ref[...] = acc_ref[...] + per_row

        @pl.when(i == pl.num_programs(1) - 1)
        def _finish():
            total = jnp.sum(acc_ref[...])                    # one XLU reduce per core
            out_ref[...] = jnp.zeros(out_ref.shape, jnp.float32) + total

    return kernel


def _choose_block_b(B, D, itemsize, block_b):
    """Pick a batch tile from the *padded* VMEM footprint (f32 tiling is (8,128))."""
    if block_b is None:
        d_pad = _round_up(D, 128)                  # lane padding of each embedding row
        per_row = (
            2 * 2 * d_pad * itemsize               # 2 inputs x 2 pipeline buffers
            + 2 * 128 * 4                          # double-buffered (tb,1) f32 target -> 128 lanes
            + 128 * 4                              # (tb,1) f32 VMEM accumulator
            + 3 * d_pad * 4                        # headroom for f32 upcast / temporaries
        )
        budget = 24 * 1024 * 1024                  # total scratch target, well under v7x 64 MiB/TC
        block_b = max(8, budget // per_row)
        # Split large batches so both cores on the parallel axis get real work.
        block_b = min(block_b, _round_up(pl.cdiv(B, _NUM_CORES), 8))
    if block_b >= B:
        return B                                   # single tile: block dim == full dim is legal
    return max(8, (block_b // 8) * 8)              # multi-tile: sublane dim multiple of 8


def contrastive_loss(output1, output2, target, *, margin=1.0, weight_diff=1.0,
                     eps=1e-6, block_b=None):
    """output1, output2: (B, D) (f32 or bf16); target: (B,). Returns scalar f32 loss."""
    B, D = output1.shape
    # Embeddings are streamed at native width (bf16 pass-through); cast is in-kernel.
    target2d = target.reshape(B, 1).astype(jnp.float32)

    tb = _choose_block_b(B, D, jnp.dtype(output1.dtype).itemsize, block_b)
    num_tiles = pl.cdiv(B, tb)
    tiles_per_core = pl.cdiv(num_tiles, _NUM_CORES)
    # Does the (cores x tiles_per_core) grid cover exactly B rows with distinct tiles?
    needs_mask = (_NUM_CORES * tiles_per_core * tb) != B
    last_blk = num_tiles - 1

    def in_map(c, i):
        # Clamp so the DMA'd block is always in-bounds; overrun rows are masked in-kernel.
        return (jnp.minimum(c * tiles_per_core + i, last_blk), 0)

    kernel = _contrastive_loss_kernel(margin, weight_diff, eps, B, tb,
                                      tiles_per_core, needs_mask)

    partials = pl.pallas_call(
        kernel,
        out_shape=jax.ShapeDtypeStruct((_NUM_CORES, 8, 128), jnp.float32),
        grid=(_NUM_CORES, tiles_per_core),
        in_specs=[
            pl.BlockSpec((tb, D), in_map),          # output1 tile
            pl.BlockSpec((tb, D), in_map),          # output2 tile
            pl.BlockSpec((tb, 1), in_map),          # target tile
        ],
        out_specs=pl.BlockSpec((1, 8, 128), lambda c, i: (c, 0, 0)),
        scratch_shapes=[pltpu.VMEM((tb, 1), jnp.float32)],   # per-core vector accumulator
        compiler_params=pltpu.CompilerParams(
            dimension_semantics=("parallel", "arbitrary"),
            vmem_limit_bytes=40 * 1024 * 1024,
        ),
    )(output1, output2, target2d)

    # Combine per-core partial sums and take the mean over the true batch.
    return jnp.sum(partials[:, 0, 0]) * (1.0 / B)


def _reference(output1, output2, target, margin=1.0, weight_diff=1.0, eps=1e-6):
    diff = output1.astype(jnp.float32) - output2.astype(jnp.float32) + eps
    d = jnp.sqrt(jnp.sum(diff * diff, axis=-1))
    loss_same = 0.5 * d ** 2
    loss_diff = 0.5 * jnp.square(jnp.maximum(margin - d, 0.0)) * weight_diff
    t = target.astype(jnp.float32)
    return jnp.mean(t * loss_same + (1.0 - t) * loss_diff)


if __name__ == "__main__":
    key = jax.random.PRNGKey(0)
    k1, k2, k3 = jax.random.split(key, 3)

    # Case 1: tiny single-tile path (second core's duplicate block fully masked).
    B, D = 8, 32
    o1 = jax.random.normal(k1, (B, D), dtype=jnp.float32)
    o2 = jax.random.normal(k2, (B, D), dtype=jnp.float32)
    tgt = jax.random.bernoulli(k3, 0.5, (B,)).astype(jnp.float32)

    loss = jax.block_until_ready(contrastive_loss(o1, o2, tgt, margin=1.0, weight_diff=1.0))
    ref = _reference(o1, o2, tgt)
    assert jnp.allclose(loss, ref, atol=1e-5, rtol=1e-5), (loss, ref)

    # Case 2: multi-tile path with remainder + clamped/duplicated tail tile
    # (exercises the 2D grid, per-core accumulators, and masking).
    B2, D2 = 20, 32
    o1b = jax.random.normal(k1, (B2, D2), dtype=jnp.float32)
    o2b = jax.random.normal(k2, (B2, D2), dtype=jnp.float32)
    tgtb = jax.random.bernoulli(k3, 0.5, (B2,)).astype(jnp.float32)

    loss2 = jax.block_until_ready(contrastive_loss(o1b, o2b, tgtb, block_b=8))
    ref2 = _reference(o1b, o2b, tgtb)
    assert jnp.allclose(loss2, ref2, atol=1e-5, rtol=1e-5), (loss2, ref2)

    # Case 3: bf16 pass-through + default tile sizing (both parallel slots get a tile).
    B3, D3 = 40, 32
    o1c = jax.random.normal(k1, (B3, D3), dtype=jnp.bfloat16)
    o2c = jax.random.normal(k2, (B3, D3), dtype=jnp.bfloat16)
    tgtc = jax.random.bernoulli(k3, 0.5, (B3,)).astype(jnp.float32)

    loss3 = jax.block_until_ready(contrastive_loss(o1c, o2c, tgtc))
    ref3 = _reference(o1c, o2c, tgtc)
    assert jnp.allclose(loss3, ref3, atol=2e-4, rtol=1e-5), (loss3, ref3)

    print("KERNEL_OK")
</pallas_src>

<mosaic_0001>
module attributes {stable_mosaic.version = 11 : i64} {
  func.func @kernel(%arg0: i32, %arg1: i32, %arg2: memref<8x32xf32, #tpu.memory_space<vmem>>, %arg3: memref<8x32xf32, #tpu.memory_space<vmem>>, %arg4: memref<8x1xf32, #tpu.memory_space<vmem>>, %arg5: memref<1x8x128xf32, #tpu.memory_space<vmem>>, %arg6: memref<8x1xf32, #tpu.memory_space<vmem>>) attributes {dimension_semantics = [#tpu.dimension_semantics<parallel>, #tpu.dimension_semantics<arbitrary>], iteration_bounds = array<i64: 2, 1>, scalar_prefetch = 0 : i64, scratch_operands = 1 : i64, tpu.core_type = #tpu.core_type<tc>, window_params = [{transform_indices = @transform_0, window_bounds = array<i64: 8, 32>}, {transform_indices = @transform_1, window_bounds = array<i64: 8, 32>}, {transform_indices = @transform_2, window_bounds = array<i64: 8, 1>}, {transform_indices = @transform_3, window_bounds = array<i64: 1, 8, 128>}]} {
    %c1_i32 = arith.constant 1 : i32
    %0 = arith.muli %arg0, %c1_i32 : i32
    %1 = arith.addi %0, %arg1 : i32
    %c0_i32 = arith.constant 0 : i32
    %2 = arith.cmpi eq, %arg1, %c0_i32 : i32
    %3 = arith.extui %2 : i1 to i32
    %c0_i32_0 = arith.constant 0 : i32
    %4 = arith.cmpi ne, %3, %c0_i32_0 : i32
    scf.if %4 {
      %cst_19 = arith.constant 0.000000e+00 : f32
      %42 = vector.broadcast %cst_19 : f32 to vector<8x1xf32>
      %c0_20 = arith.constant 0 : index
      %c0_21 = arith.constant 0 : index
      %43 = vector.load %arg6[%c0_20, %c0_21] : memref<8x1xf32, #tpu.memory_space<vmem>>, vector<8x1xf32>
      tpu.vector_store %arg6[%c0_20, %c0_21], %42 {strides = array<i32>} : memref<8x1xf32, #tpu.memory_space<vmem>>, vector<8x1xf32>,
    } else {
    }
    %c0 = arith.constant 0 : index
    %c0_1 = arith.constant 0 : index
    %5 = vector.load %arg2[%c0, %c0_1] : memref<8x32xf32, #tpu.memory_space<vmem>>, vector<8x32xf32>
    %c0_2 = arith.constant 0 : index
    %c0_3 = arith.constant 0 : index
    %6 = vector.load %arg3[%c0_2, %c0_3] : memref<8x32xf32, #tpu.memory_space<vmem>>, vector<8x32xf32>
    %c0_4 = arith.constant 0 : index
    %c0_5 = arith.constant 0 : index
    %7 = vector.load %arg4[%c0_4, %c0_5] : memref<8x1xf32, #tpu.memory_space<vmem>>, vector<8x1xf32>
    %8 = arith.subf %5, %6 : vector<8x32xf32>
    %cst = arith.constant 9.99999997E-7 : f32
    %9 = vector.broadcast %cst : f32 to vector<8x32xf32>
    %10 = arith.addf %8, %9 : vector<8x32xf32>
    %11 = arith.mulf %10, %10 : vector<8x32xf32>
    %cst_6 = arith.constant dense<0.000000e+00> : vector<8xf32>
    %12 = vector.multi_reduction <add>, %11, %cst_6 [1] : vector<8x32xf32> to vector<8xf32>
    %13 = vector.shape_cast %12 : vector<8xf32> to vector<8x1xf32>
    %14 = math.sqrt %13 : vector<8x1xf32>
    %cst_7 = arith.constant 5.000000e-01 : f32
    %15 = vector.broadcast %cst_7 : f32 to vector<8x1xf32>
    %16 = arith.mulf %15, %13 : vector<8x1xf32>
    %cst_8 = arith.constant 1.000000e+00 : f32
    %17 = vector.broadcast %cst_8 : f32 to vector<8x1xf32>
    %18 = arith.subf %17, %14 : vector<8x1xf32>
    %cst_9 = arith.constant 0.000000e+00 : f32
    %19 = vector.broadcast %cst_9 : f32 to vector<8x1xf32>
    %20 = arith.maximumf %18, %19 : vector<8x1xf32>
    %cst_10 = arith.constant 5.000000e-01 : f32
    %21 = vector.broadcast %cst_10 : f32 to vector<8x1xf32>
    %22 = arith.mulf %21, %20 : vector<8x1xf32>
    %23 = arith.mulf %22, %20 : vector<8x1xf32>
    %cst_11 = arith.constant 1.000000e+00 : f32
    %24 = vector.broadcast %cst_11 : f32 to vector<8x1xf32>
    %25 = arith.mulf %23, %24 : vector<8x1xf32>
    %26 = arith.mulf %7, %16 : vector<8x1xf32>
    %cst_12 = arith.constant 1.000000e+00 : f32
    %27 = vector.broadcast %cst_12 : f32 to vector<8x1xf32>
    %28 = arith.subf %27, %7 : vector<8x1xf32>
    %29 = arith.mulf %28, %25 : vector<8x1xf32>
    %30 = arith.addf %26, %29 : vector<8x1xf32>
    %c1_i32_13 = arith.constant 1 : i32
    %31 = arith.addi %1, %c1_i32_13 : i32
    %c8_i32 = arith.constant 8 : i32
    %32 = arith.muli %31, %c8_i32 : i32
    %c8_i32_14 = arith.constant 8 : i32
    %33 = arith.cmpi sgt, %32, %c8_i32_14 : i32
    %34 = arith.extui %33 : i1 to i32
    %c0_i32_15 = arith.constant 0 : i32
    %35 = arith.cmpi ne, %34, %c0_i32_15 : i32
    scf.if %35 {
      %c8_i32_19 = arith.constant 8 : i32
      %42 = arith.muli %1, %c8_i32_19 : i32
      %43 = tpu.iota {dimensions = array<i32: 0>} : vector<8x1xi32>
      %44 = vector.broadcast %42 : i32 to vector<8x1xi32>
      %45 = arith.addi %44, %43 : vector<8x1xi32>
      %c0_20 = arith.constant 0 : index
      %c0_21 = arith.constant 0 : index
      %46 = vector.load %arg6[%c0_20, %c0_21] : memref<8x1xf32, #tpu.memory_space<vmem>>, vector<8x1xf32>
      %c8_i32_22 = arith.constant 8 : i32
      %47 = vector.broadcast %c8_i32_22 : i32 to vector<8x1xi32>
      %48 = arith.cmpi slt, %45, %47 : vector<8x1xi32>
      %cst_23 = arith.constant 0.000000e+00 : f32
      %49 = vector.broadcast %cst_23 : f32 to vector<8x1xf32>
      %50 = arith.select %48, %30, %49 : vector<8x1xi1>, vector<8x1xf32>
      %51 = arith.addf %46, %50 : vector<8x1xf32>
      %c0_24 = arith.constant 0 : index
      %c0_25 = arith.constant 0 : index
      %52 = vector.load %arg6[%c0_24, %c0_25] : memref<8x1xf32, #tpu.memory_space<vmem>>, vector<8x1xf32>
      tpu.vector_store %arg6[%c0_24, %c0_25], %51 {strides = array<i32>} : memref<8x1xf32, #tpu.memory_space<vmem>>, vector<8x1xf32>,
    } else {
    }
    %true = arith.constant true
    %36 = arith.xori %33, %true : i1
    %37 = arith.extui %36 : i1 to i32
    %c0_i32_16 = arith.constant 0 : i32
    %38 = arith.cmpi ne, %37, %c0_i32_16 : i32
    scf.if %38 {
      %c0_19 = arith.constant 0 : index
      %c0_20 = arith.constant 0 : index
      %42 = vector.load %arg6[%c0_19, %c0_20] : memref<8x1xf32, #tpu.memory_space<vmem>>, vector<8x1xf32>
      %43 = arith.addf %42, %30 : vector<8x1xf32>
      %c0_21 = arith.constant 0 : index
      %c0_22 = arith.constant 0 : index
      %44 = vector.load %arg6[%c0_21, %c0_22] : memref<8x1xf32, #tpu.memory_space<vmem>>, vector<8x1xf32>
      tpu.vector_store %arg6[%c0_21, %c0_22], %43 {strides = array<i32>} : memref<8x1xf32, #tpu.memory_space<vmem>>, vector<8x1xf32>,
    } else {
    }
    %c0_i32_17 = arith.constant 0 : i32
    %39 = arith.cmpi eq, %arg1, %c0_i32_17 : i32
    %40 = arith.extui %39 : i1 to i32
    %c0_i32_18 = arith.constant 0 : i32
    %41 = arith.cmpi ne, %40, %c0_i32_18 : i32
    scf.if %41 {
      %c0_19 = arith.constant 0 : index
      %c0_20 = arith.constant 0 : index
      %42 = vector.load %arg6[%c0_19, %c0_20] : memref<8x1xf32, #tpu.memory_space<vmem>>, vector<8x1xf32>
      %43 = vector.shape_cast %42 : vector<8x1xf32> to vector<1x8x1xf32>
      %cst_21 = arith.constant dense<0.000000e+00> : vector<1xf32>
      %44 = vector.multi_reduction <add>, %43, %cst_21 [1, 2] : vector<1x8x1xf32> to vector<1xf32>
      %45 = vector.shape_cast %44 : vector<1xf32> to vector<1x1x1xf32>
      %46 = vector.extract %45[0, 0, 0] : f32 from vector<1x1x1xf32>
      %cst_22 = arith.constant 0.000000e+00 : f32
      %47 = vector.broadcast %cst_22 : f32 to vector<1x8x128xf32>
      %48 = vector.broadcast %46 : f32 to vector<1x8x128xf32>
      %49 = arith.addf %47, %48 : vector<1x8x128xf32>
      %c0_23 = arith.constant 0 : index
      %c0_24 = arith.constant 0 : index
      %c0_25 = arith.constant 0 : index
      %50 = vector.load %arg5[%c0_23, %c0_24, %c0_25] : memref<1x8x128xf32, #tpu.memory_space<vmem>>, vector<1x8x128xf32>
      tpu.vector_store %arg5[%c0_23, %c0_24, %c0_25], %49 {strides = array<i32>} : memref<1x8x128xf32, #tpu.memory_space<vmem>>, vector<1x8x128xf32>,
    } else {
    }
    return
  }
  func.func @transform_0(%arg0: i32, %arg1: i32) -> (i32, i32) {
    %c1_i32 = arith.constant 1 : i32
    %0 = arith.muli %arg0, %c1_i32 : i32
    %1 = arith.addi %0, %arg1 : i32
    %c0_i32 = arith.constant 0 : i32
    %2 = arith.minsi %1, %c0_i32 : i32
    %c0_i32_0 = arith.constant 0 : i32
    %c0_i32_1 = arith.constant 0 : i32
    return %2, %c0_i32_0 : i32, i32
  }
  func.func @transform_1(%arg0: i32, %arg1: i32) -> (i32, i32) {
    %c1_i32 = arith.constant 1 : i32
    %0 = arith.muli %arg0, %c1_i32 : i32
    %1 = arith.addi %0, %arg1 : i32
    %c0_i32 = arith.constant 0 : i32
    %2 = arith.minsi %1, %c0_i32 : i32
    %c0_i32_0 = arith.constant 0 : i32
    %c0_i32_1 = arith.constant 0 : i32
    return %2, %c0_i32_0 : i32, i32
  }
  func.func @transform_2(%arg0: i32, %arg1: i32) -> (i32, i32) {
    %c1_i32 = arith.constant 1 : i32
    %0 = arith.muli %arg0, %c1_i32 : i32
    %1 = arith.addi %0, %arg1 : i32
    %c0_i32 = arith.constant 0 : i32
    %2 = arith.minsi %1, %c0_i32 : i32
    %c0_i32_0 = arith.constant 0 : i32
    %c0_i32_1 = arith.constant 0 : i32
    return %2, %c0_i32_0 : i32, i32
  }
  func.func @transform_3(%arg0: i32, %arg1: i32) -> (i32, i32, i32) {
    %c0_i32 = arith.constant 0 : i32
    %c0_i32_0 = arith.constant 0 : i32
    %c0_i32_1 = arith.constant 0 : i32
    return %arg0, %c0_i32, %c0_i32_0 : i32, i32, i32
  }
}

</mosaic_0001>

<bundles_post_ra>
// kernel: tpu_custom_call.1
= control target key start
LH: loop header
LB: loop body
LE: loop exit
PB: predicated region body
PF: predicated region fallthrough
CT: control target
= control target key end

     0   :  { %8 = vsyncpa [#allocation4], 0  ;;  %s933_s0 = inlined_call_operand.vmem [shape: f32[8,32], index: 0, kind: input, shape index: {}]   ;;  %s934_s1 = inlined_call_operand.hbm [shape: f32[8,32], index: 1, kind: input, shape index: {}]   ;;  %s935_s2 = inlined_call_operand.vmem [shape: f32[8,1], index: 2, kind: input, shape index: {}]   ;;  %s936_s3 = inlined_call_operand.hbm [shape: f32[2,8,128], index: 3, kind: output, shape index: {}]  }
   0x1   :  { %10 = vsyncpa [#allocation4 + $0x1], 0 }
   0x2   :  { %11 = vsyncpa [#allocation5], 0 }
   0x3   :  { %13 = vsyncpa [#allocation5 + $0x1], 0  ;;  %s750_s12 = smov 0   ;;  %s752_s13 = smov 0  }
   0x4   :  { %s754_s14 = smov 0   ;;  %s756_s15 = smov 0  }
   0x5   :  { %s758_s16 = smov 0   ;;  %s760_s17 = smov 0  }
   0x6   :  { %s762_s18 = smov 0   ;;  %s764_s19 = smov 0  }
   0x7 LB: > { %s478_s20 = sadd.s32 4294967295, %s725_s19   ;;  %s479_s21 = sadd.s32 4294967294, %s725_s19   ;;  %s725_s19 = sphi %s764_s19, %s19_s19   ;;  %s721_s18 = sphi %s762_s18, %s955_s18   ;;  %s717_s17 = sphi %s760_s17, %s954_s17   ;;  %s713_s16 = sphi %s758_s16, %s923_s16   ;;  %s709_s15 = sphi %s756_s15, %s953_s15   ;;  %s705_s14 = sphi %s754_s14, %s952_s14   ;;  %s701_s13 = sphi %s752_s13, %s951_s13   ;;  %s697_s12 = sphi %s750_s12, %s950_s12  }
   0x8   : > { %s31_s22 = sadd.s32 1, %s721_s18  ;;  %p694_p1 = scmp.ne.s32.totalorder %s713_s16, 0 }
   0x9   : > { %p33_p0 = scmp.ge.s32.totalorder %s31_s22, 2  ;;  %p84_p2 = scmp.eq.s32.totalorder %s725_s19, 0 }
   0xa   : > { %p89_p3 = scmp.ne.s32.totalorder %s713_s16, %s709_s15  ;;  %p90_p5 = scmp.eq.s32.totalorder %s478_s20, 0 }
   0xb   : > { %s957_s22 = smov (%p33_p0, %s31_s22), 0  ;;  %p796_p4 = por %p694_p1, %p84_p2 }
   0xc   : > { %p800_p6 = por %p90_p5, %p89_p3  ;;  %s131_s25 = ssub.s32 %s721_s18, %s957_s22 }
   0xd   : > { %p132_p7 = scmp.eq.s32.totalorder %s131_s25, 0  ;;  %s134_s26 = sadd.s32 1, %s705_s14 }
   0xe   : > { %s940_s24 = scalar_select %p800_p6, 1, 0 }
   0xf   : > { %s808_s27 = scalar_select %p132_p7, %s705_s14, %s134_s26  }
  0x10   : > { %p144_p8 = scmp.ne.s32.totalorder %s705_s14, %s701_s13  ;;  %p145_p9 = scmp.eq.s32.totalorder %s478_s20, 1 }
  0x11   : > { %p150_p10 = scmp.ne.s32.totalorder %s701_s13, %s697_s12  ;;  %p151_p11 = scmp.eq.s32.totalorder %s479_s21, 1 }
  0x12   : > { %p814_p12 = por %p145_p9, %p144_p8  ;;  %p519_p1 = scmp.lt.s32.totalorder %s725_s19, 2 }
  0x13   : > { %p819_p0 = por %p151_p11, %p150_p10  ;;  %s727_s30 = smov [#allocation3]  }
  0x14   : > { %s941_s28 = scalar_select %p814_p12, 1, 0 }
  0x15   : > { %s942_s29 = scalar_select %p819_p0, 1, 0 }
  0x16   : > { %s198_s4 = sshll.u32 %s727_s30, 4  ;;  %p826_p2 = pnand %p519_p1, %p796_p4  ;;  %s199_s4 = int_to_ptr.vmem [resolvable:$true] %s198_s4 }
  0x17   : > { %s596_s8 = scalar_lea.hbm %s934_s1, 128 }
  0x18   : > { %p597_p7 = scmp.ne.s32.totalorder %s934_s1, %s596_s8  ;;  %p598_p8 = pneg %p826_p2 }
  0x19   : > { %p603_p4 = scmp.lt.s32.totalorder %s596_s8, %s596_s8 }
  0x1a   : > { %p599_p9 = pnand %p598_p8, %p597_p7 }
  0x1c   : > { %p600_p10 = pneg %p599_p9 }
  0x1e   : > { %p605_p11 = pnand %p603_p4, %p600_p10 }
  0x20   : > { %608 = shalt.err (!%p605_p11)
}
  0x21   : > { %s609_s11 = scalar_lea.vmem %s199_s4, 128  ;;  %s616_s15 = scalar_lea.vmem %s199_s4, 256 }
  0x22   : > { %p610_p1 = scmp.ne.s32.totalorder %s199_s4, %s609_s11  ;;  %p617_p5 = scmp.lt.s32.totalorder %s199_s4, %s199_s4 }
  0x23   : > { %p618_p0 = scmp.lt.s32.totalorder %s616_s15, %s609_s11 }
  0x24   : > { %p612_p13 = pnand %p610_p1, %p598_p8 }
  0x25   : > { %p619_p12 = por %p618_p0, %p617_p5 }
  0x26   : > { %p613_p3 = pneg %p612_p13 }
  0x28   : > { %p620_p6 = pnand %p619_p12, %p613_p3 }
  0x2a   : > { %623 = shalt.err (!%p620_p6)
}
  0x2b   : > { %514 = dma.hbm_to_vmem [thread:$0]  (!%p826_p2), %s934_s1, 128, %s199_s4, [#allocation4]  }
  0x2c   : > { %p944_p7 = scmp.lt.s32.totalorder %s725_s19, 3  ;;  %p945_p9 = scmp.ge.s32.totalorder %s725_s19, 1 }
  0x2e   : > { %p217_p10 = pnand %p945_p9, %p944_p7 }
  0x2f   : > { %s222_s23 = sand.u32 (!%p217_p10), 1, %s713_s16   ;;  %p946_p12 = scmp.ne.s32.totalorder (!%p217_p10), %s940_s24, 0 }
  0x30   : > { %220 = sbr.rel (%p217_p10) target bundleno = 480 (0x1e0), region = 32  ;;  %s485_s25 = sshll.u32 (!%p217_p10), %s222_s23, 3 }
  0x31   : > { %s223_s26 = scalar_lea.sflag (!%p217_p10), [#allocation4], %s222_s23  ;;  %s226_s30 = scalar_lea.vmem (!%p217_p10), [#allocation3], %s485_s25 }
  0x35   : > { %687 = dma.done.wait (%p946_p12), %s223_s26, 128  }
  0x36   : > { %689 = vsyncadd (%p946_p12), %s223_s26, 4294967168  ;;  %vm291_vm0 = vcmask 7168   ;;  %s260_s4 = sand.u32 1, %s701_s13   ;;  %p264_p6 = scmp.lt.s32.totalorder %s717_s17, 0  ;;  %v728_v0 = vmov 0.0   ;;  %v294_v1 = vld [vmem:[%s226_s30] sm:$0xff] }
  0x37   : > { %292 = vst.msk [vmem:[#allocation2] sm:$0xff] %vm291_vm0, %v728_v0  ;;  %s859_s5 = sshll.u32 %s260_s4, 3  ;;  %vm299_vm1 = vcmask 261120   ;;  %s503_s10 = sshll.u32 %s717_s17, 3 }
  0x38   : > { %s265_s6 = scalar_select %p264_p6, %s717_s17, 0 }
  0x39   : > { %s866_s11 = sadd.s32 8, %s503_s10  ;;  %s262_s23 = scalar_lea.vmem [#allocation6], %s859_s5 }
  0x3a   : > { %s959_s6 = smov (!%p264_p6, %s265_s6), 0  ;;  %p496_p13 = scmp.le.s32.totalorder %s866_s11, 8 }
  0x3b   : > { %s490_s7 = sshll.u32 %s959_s6, 3 }
  0x3c   : > { %s269_s9 = scalar_lea.vmem %s933_s0, %s490_s7  ;;  %s282_s21 = scalar_lea.vmem %s935_s2, %s490_s7 }
  0x3d   : > { %v293_v2 = vld [vmem:[%s269_s9] sm:$0xff] }
  0x3e   : > { %v296_v3 = vsub.f32 %v293_v2, %v294_v1  ;;  %v295_v15 = vld [vmem:[%s282_s21] sm:$0xff] }
  0x3f   : > { %v316_v16 = vsub.f32 1.0, %v295_v15 }
  0x40   : > { %v297_v4 = vadd.f32 1e-06, %v296_v3 }
  0x42   : > { %v298_v5 = vmul.f32 %v297_v4, %v297_v4 }
  0x44   : > { %v300_v6 = vsel %vm299_vm1, %v298_v5, 0.0 }
  0x45   : > { %301 = vadd.xlane.f32.xlu0 %v300_v6 }
  0xce   : > { %v302_v7 = vpop.xlane.xlu0 %301 }
  0xcf   : > { %594 = vrsqrt.f32 %v302_v7  ;;  %vm305_vm2 = vcmp.eq.f32.partialorder %v302_v7, inf  ;;  %v308_v10 = vand.u32 2147483648, %v302_v7  ;;  %vm307_vm3 = vcmp.eq.f32.partialorder %v302_v7, 0.0 }
  0xd0   : > { %v310_v17 = vmul.f32 0.5, %v302_v7 }
  0xd2   : > { %v315_v20 = vmul.f32 %v310_v17, %v295_v15 }
  0xdc   : > { %v595_v8 = vpop.eup %594 }
  0xdd   : > { %v304_v9 = vmul.f32 %v595_v8, %v302_v7 }
  0xdf   : > { %v306_v11 = vsel %vm305_vm2, %v302_v7, %v304_v9 }
  0xe0   : > { %v309_v12 = vsel %vm307_vm3, %v308_v10, %v306_v11 }
  0xe1   : > { %v311_v13 = vsub.f32 1.0, %v309_v12 }
  0xe3   : > { %v312_v14 = vmax.f32 %v311_v13, 0.0 }
  0xe5   : > { %v313_v18 = vmul.f32 0.5, %v312_v14 }
  0xe7   : > { %v314_v19 = vmul.f32 %v313_v18, %v312_v14  ;;  %324 = sbr.rel (%p496_p13) target bundleno = 247 (0xf7), region = 44 }
  0xe9   : > { %v317_v21 = vmul.f32 %v316_v16, %v314_v19 }
  0xeb   : > { %v318_v22 = vadd.f32 %v317_v21, %v315_v20 }
  0xec   : > { %v326_v23 = vlaneseq  ;;  %v328_v24 = vstv %s503_s10  ;;  %v330_v27 = vld [vmem:[#allocation2] sm:$0xff] }
  0xee   : > { %v327_v25 = vshrl.u32 %v326_v23, 7 }
  0xf0   : > { %v329_v26 = vadd.s32 %v328_v24, %v327_v25 }
  0xf2   : > { %vm331_vm4 = vcmp.lt.s32.totalorder %v329_v26, 8 }
  0xf3   : > { %v332_v28 = vsel %vm331_vm4, %v318_v22, 0.0 }
  0xf4   : > { %v333_v29 = vadd.f32 %v332_v28, %v330_v27 }
  0xf6   : > { %335 = vst.msk [vmem:[#allocation2] sm:$0xff] %vm291_vm0, %v333_v29 }
  0xf7 PF: > { %p498_p0 = scmp.gt.s32.totalorder %s866_s11, 8 }
  0xf9   : > { %339 = sbr.rel (%p498_p0) target bundleno = 258 (0x102), region = 48 }
  0xfe   : > { %v340_v30 = vld [vmem:[#allocation2] sm:$0xff] }
  0xff   : > { %v341_v31 = vadd.f32 %v340_v30, %v318_v22 }
 0x101   : > { %343 = vst.msk [vmem:[#allocation2] sm:$0xff] %vm291_vm0, %v341_v31 }
 0x102 PF: > { %s500_s25 = sshll.u32 %s717_s17, 7  ;;  %s376_s26 = sshll.u32 %s262_s23, 4  ;;  %s377_s26 = int_to_ptr.vmem [resolvable:$true] %s376_s26 }
 0x103   : > { %s883_s7 = scalar_lea.hbm %s936_s3, %s500_s25  ;;  %s363_s8 = scalar_lea.sflag [#allocation5], %s260_s4 }
 0x104   : > { %s624_s9 = scalar_lea.vmem %s377_s26, 128  ;;  %p947_p3 = scmp.ne.s32.totalorder %s941_s28, 0 }
 0x105   : > { %p625_p2 = scmp.ne.s32.totalorder %s377_s26, %s624_s9  ;;  %s729_s17 = smov [#allocation6]  }
 0x106   : > { %s628_s10 = sshll.u32 %s729_s17, 4  ;;  %s629_s10 = int_to_ptr.vmem [resolvable:$false] %s628_s10 }
 0x107   : > { %p626_p5 = pnand %p625_p2, %p947_p3  ;;  %s630_s11 = scalar_lea.vmem %s629_s10, 256 }
 0x108   : > { %v347_v32 = vld [vmem:[#allocation2] sm:$0xff]  ;;  %p631_p4 = scmp.lt.s32.totalorder %s377_s26, %s629_s10  ;;  %p632_p11 = scmp.lt.s32.totalorder %s630_s11, %s624_s9 }
 0x109   : > { %v349_v33 = vsel %vm291_vm0, %v347_v32, 0.0  ;;  %p627_p8 = pneg %p626_p5 }
 0x10a   : > { %350 = vadd.xlane.f32.xlu0 %v349_v33  ;;  %p633_p1 = por %p632_p11, %p631_p4 }
 0x10c   : > { %p634_p7 = pnand %p633_p1, %p627_p8 }
 0x193   : > { %v351_v34 = vpop.xlane.xlu0 %350 }
 0x194   : > { %v352_v35 = vrot.slane %v351_v34, 4 }
 0x196   : > { %v353_v36 = vadd.f32 %v352_v35, %v351_v34 }
 0x198   : > { %v354_v37 = vrot.slane %v353_v36, 2 }
 0x19a   : > { %v355_v38 = vadd.f32 %v354_v37, %v353_v36 }
 0x19c   : > { %v356_v39 = vrot.slane %v355_v38, 1 }
 0x19e   : > { %v357_v40 = vadd.f32 %v356_v39, %v355_v38 }
 0x1a0   : > { %505 = vpush %v357_v40 }
 0x1d1   : > { %s506_s24 = spop %505 }
 0x1d2   : > { %v359_v41 = vstv %s506_s24 }
 0x1d3   : > { %361 = vst [vmem:[%s262_s23] sm:$0xff] %v359_v41 }
 0x1d4   : > { %637 = shalt.err (!%p634_p7)
}
 0x1d5   : > { %s638_s5 = scalar_lea.hbm %s883_s7, 128  ;;  %s642_s20 = scalar_lea.hbm %s936_s3, 256 }
 0x1d6   : > { %p639_p9 = scmp.ne.s32.totalorder %s883_s7, %s638_s5  ;;  %p643_p6 = scmp.lt.s32.totalorder %s883_s7, %s936_s3 }
 0x1d7   : > { %p644_p13 = scmp.lt.s32.totalorder %s642_s20, %s638_s5 }
 0x1d8   : > { %p640_p10 = pnand %p639_p9, %p947_p3 }
 0x1d9   : > { %p645_p0 = por %p644_p13, %p643_p6 }
 0x1da   : > { %p641_p12 = pneg %p640_p10 }
 0x1dc   : > { %p646_p2 = pnand %p645_p0, %p641_p12 }
 0x1de   : > { %649 = shalt.err (!%p646_p2)
}
 0x1df   : > { %509 = dma.vmem_to_hbm [thread:$0]  (%p947_p3), %s377_s26, 128, %s883_s7, %s363_s8  }
 0x1e0 PF: > { %s388_s25 = sand.u32 1, %s697_s12   ;;  %p948_p5 = scmp.ne.s32.totalorder %s942_s29, 0 }
 0x1e1   : > { %p949_p8 = scmp.ge.s32.totalorder %s725_s19, 2  ;;  %s389_s30 = scalar_lea.sflag [#allocation5], %s388_s25 }
 0x1e3   : > { %p516_p4 = pnand %p949_p8, %p948_p5 }
 0x1e5   : > { %p517_p11 = pneg %p516_p4 }
 0x1e7   : > { %691 = dma.done.wait (%p517_p11), %s389_s30, 128  }
 0x1e8   : > { %693 = vsyncadd (%p517_p11), %s389_s30, 4294967168  ;;  %s19_s19 = sadd.s32 1, %s725_s19   ;;  %s950_s12 = smov %s701_s13 }
 0x1e9   : > { %p16_p1 = scmp.ge.s32.totalorder %s19_s19, 4   ;;  %s951_s13 = smov %s705_s14 }
 0x1ea   : > { %s952_s14 = smov %s808_s27  ;;  %s953_s15 = smov %s713_s16 }
 0x1eb   : > { %s923_s16 = smov 0   ;;  %s954_s17 = smov %s721_s18 }
 0x1ec   : > { %s955_s18 = smov %s957_s22  ;;  %18 = sbr.rel (!%p16_p1) target bundleno = 7 (0x7), region = 99 }
 0x1f1   :  { %394 = vsyncpa [#allocation4], 1 }
 0x1f2   :  { %396 = vsyncpa [#allocation4 + $0x1], 1 }
 0x1f3   :  { %397 = vsyncpa [#allocation5], 1 }
 0x1f4   :  { %399 = vsyncpa [#allocation5 + $0x1], 1 }

</bundles_post_ra>
